<compile_context>
chip_gen: v7x
topology: tpu7x:2x2x1
jax: 0.10.0
libtpu: 0.0.40
codegen_flags: <defaults>
</compile_context>

<pallas_src>
import functools

import jax
import jax.numpy as jnp
from jax.experimental import pallas as pl
from jax.experimental.pallas import tpu as pltpu


def _round_up(n: int, m: int) -> int:
    return ((n + m - 1) // m) * m


def mlp_kernel(params_ref, x_ref, o_ref):
    """params_ref: SMEM (9,) f32 = [w1_00, w1_01, w1_10, w1_11, b1_0, b1_1, w2_00, w2_01, b2_0]
    x_ref: VMEM (2, TB) feature-major input tile.  o_ref: VMEM (1, TB) output tile."""
    # Scalar parameter reads from SMEM (broadcast against full vregs on the VPU).
    w1_00 = params_ref[0]
    w1_01 = params_ref[1]
    w1_10 = params_ref[2]
    w1_11 = params_ref[3]
    b1_0 = params_ref[4]
    b1_1 = params_ref[5]
    w2_00 = params_ref[6]
    w2_01 = params_ref[7]
    b2_0 = params_ref[8]

    x = x_ref[...]                    # (2, TB) f32, lane-dense
    x0 = x[0:1, :]                    # (1, TB)
    x1 = x[1:2, :]                    # (1, TB)

    # fc1 + sigmoid  (PyTorch Linear: h_j = sum_k x_k * W1[j, k] + b1[j])
    h0 = jax.nn.sigmoid(x0 * w1_00 + x1 * w1_01 + b1_0)
    h1 = jax.nn.sigmoid(x0 * w1_10 + x1 * w1_11 + b1_1)

    # fc2 + sigmoid
    y = jax.nn.sigmoid(h0 * w2_00 + h1 * w2_01 + b2_0)
    o_ref[...] = y.astype(o_ref.dtype)


@functools.partial(jax.jit, static_argnames=("tb",))
def mlp_forward(x, w1, b1, w2, b2, *, tb: int = 8192):
    """x: (B, 2) f32.  w1: (2, 2) PyTorch-layout (out, in), b1: (2,), w2: (1, 2), b2: (1,).
    Returns (B, 1) f32 = sigmoid(sigmoid(x @ w1.T + b1) @ w2.T + b2)."""
    B = x.shape[0]

    # Batch tile: multiple of 128 (lane width), capped at `tb`; tiny VMEM footprint
    # (24 * TB bytes double-buffered), safe on v5e/v6e/v7x.
    tile_b = min(tb, _round_up(B, 128))
    b_pad = _round_up(B, tile_b)
    grid = (b_pad // tile_b,)

    # Feature-major, lane-dense layout: (2, B_pad) input, (1, B_pad) output.
    xt = jnp.pad(x.astype(jnp.float32).T, ((0, 0), (0, b_pad - B)))

    # All 9 parameters as one flat SMEM-resident scalar vector.
    params = jnp.concatenate(
        [w1.reshape(-1), b1.reshape(-1), w2.reshape(-1), b2.reshape(-1)]
    ).astype(jnp.float32)                                           # (9,)

    out = pl.pallas_call(
        mlp_kernel,
        out_shape=jax.ShapeDtypeStruct((1, b_pad), jnp.float32),
        grid=grid,
        in_specs=[
            pl.BlockSpec(memory_space=pltpu.MemorySpace.SMEM),       # params (whole, SMEM)
            pl.BlockSpec((2, tile_b), lambda i: (0, i)),             # x tile (lane-dense)
        ],
        out_specs=pl.BlockSpec((1, tile_b), lambda i: (0, i)),       # y tile (lane-dense)
        compiler_params=pltpu.CompilerParams(
            dimension_semantics=("parallel",),                       # 2 TCs on v7x
        ),
        cost_estimate=pl.CostEstimate(
            flops=9 * b_pad,
            transcendentals=3 * b_pad,
            bytes_accessed=12 * b_pad,
        ),
    )(params, xt)

    return out[0, :B].reshape(B, 1)


def init_params(key):
    """Deterministic init mimicking PyTorch nn.Linear default (uniform +-1/sqrt(fan_in))."""
    k1, k2, k3, k4 = jax.random.split(key, 4)
    bound1 = 1.0 / jnp.sqrt(2.0)
    w1 = jax.random.uniform(k1, (2, 2), jnp.float32, -bound1, bound1)  # (out, in)
    b1 = jax.random.uniform(k2, (2,), jnp.float32, -bound1, bound1)
    bound2 = 1.0 / jnp.sqrt(2.0)
    w2 = jax.random.uniform(k3, (1, 2), jnp.float32, -bound2, bound2)  # (out, in)
    b2 = jax.random.uniform(k4, (1,), jnp.float32, -bound2, bound2)
    return w1, b1, w2, b2


def _reference(x, w1, b1, w2, b2):
    return jax.nn.sigmoid(jax.nn.sigmoid(x @ w1.T + b1) @ w2.T + b2)


if __name__ == "__main__":
    key = jax.random.PRNGKey(0)
    kx, kp = jax.random.split(key)
    w1, b1, w2, b2 = init_params(kp)

    # 1) XOR-style inputs: batch of 4, 2 features (the module's intended use).
    x_small = jnp.array([[0.0, 0.0], [0.0, 1.0], [1.0, 0.0], [1.0, 1.0]],
                        dtype=jnp.float32)
    out_small = jax.block_until_ready(mlp_forward(x_small, w1, b1, w2, b2))
    ref_small = _reference(x_small, w1, b1, w2, b2)
    assert out_small.shape == (4, 1)
    assert jnp.allclose(out_small, ref_small, atol=1e-6), (out_small, ref_small)

    # 2) Ragged batch exercising multiple grid steps + padding (tb=128 -> 5 tiles).
    x_big = jax.random.uniform(kx, (515, 2), jnp.float32)
    out_big = jax.block_until_ready(mlp_forward(x_big, w1, b1, w2, b2, tb=128))
    ref_big = _reference(x_big, w1, b1, w2, b2)
    assert out_big.shape == (515, 1)
    assert jnp.allclose(out_big, ref_big, atol=1e-6)

    print("KERNEL_OK")
</pallas_src>

<mosaic_0001>
module attributes {stable_mosaic.version = 11 : i64} {
  func.func @mlp_kernel(%arg0: i32, %arg1: memref<9xf32, #tpu.memory_space<smem>>, %arg2: memref<2x128xf32, #tpu.memory_space<vmem>>, %arg3: memref<1x128xf32, #tpu.memory_space<vmem>>) attributes {dimension_semantics = [#tpu.dimension_semantics<parallel>], iteration_bounds = array<i64: 1>, scalar_prefetch = 0 : i64, scratch_operands = 0 : i64, tpu.core_type = #tpu.core_type<tc>, window_params = [{transform_indices = @transform_0, window_bounds = array<i64: 9>}, {transform_indices = @transform_1, window_bounds = array<i64: 2, 128>}, {transform_indices = @transform_2, window_bounds = array<i64: 1, 128>}]} {
    %c0 = arith.constant 0 : index
    %0 = memref.load %arg1[%c0] : memref<9xf32, #tpu.memory_space<smem>>
    %c1 = arith.constant 1 : index
    %1 = memref.load %arg1[%c1] : memref<9xf32, #tpu.memory_space<smem>>
    %c2 = arith.constant 2 : index
    %2 = memref.load %arg1[%c2] : memref<9xf32, #tpu.memory_space<smem>>
    %c3 = arith.constant 3 : index
    %3 = memref.load %arg1[%c3] : memref<9xf32, #tpu.memory_space<smem>>
    %c4 = arith.constant 4 : index
    %4 = memref.load %arg1[%c4] : memref<9xf32, #tpu.memory_space<smem>>
    %c5 = arith.constant 5 : index
    %5 = memref.load %arg1[%c5] : memref<9xf32, #tpu.memory_space<smem>>
    %c6 = arith.constant 6 : index
    %6 = memref.load %arg1[%c6] : memref<9xf32, #tpu.memory_space<smem>>
    %c7 = arith.constant 7 : index
    %7 = memref.load %arg1[%c7] : memref<9xf32, #tpu.memory_space<smem>>
    %c8 = arith.constant 8 : index
    %8 = memref.load %arg1[%c8] : memref<9xf32, #tpu.memory_space<smem>>
    %c0_0 = arith.constant 0 : index
    %c0_1 = arith.constant 0 : index
    %9 = vector.load %arg2[%c0_0, %c0_1] : memref<2x128xf32, #tpu.memory_space<vmem>>, vector<2x128xf32>
    %10 = vector.extract_strided_slice %9 {offsets = [0, 0], sizes = [1, 128], strides = [1, 1]} : vector<2x128xf32> to vector<1x128xf32>
    %11 = vector.extract_strided_slice %9 {offsets = [1, 0], sizes = [1, 128], strides = [1, 1]} : vector<2x128xf32> to vector<1x128xf32>
    %12 = vector.broadcast %0 : f32 to vector<1x128xf32>
    %13 = arith.mulf %10, %12 : vector<1x128xf32>
    %14 = vector.broadcast %1 : f32 to vector<1x128xf32>
    %15 = arith.mulf %11, %14 : vector<1x128xf32>
    %16 = arith.addf %13, %15 : vector<1x128xf32>
    %17 = vector.broadcast %4 : f32 to vector<1x128xf32>
    %18 = arith.addf %16, %17 : vector<1x128xf32>
    %19 = arith.negf %18 : vector<1x128xf32>
    %20 = math.exp %19 : vector<1x128xf32>
    %cst = arith.constant 1.000000e+00 : f32
    %21 = vector.broadcast %cst : f32 to vector<1x128xf32>
    %22 = arith.addf %21, %20 : vector<1x128xf32>
    %23 = arith.divf %21, %22 : vector<1x128xf32>
    %24 = vector.broadcast %2 : f32 to vector<1x128xf32>
    %25 = arith.mulf %10, %24 : vector<1x128xf32>
    %26 = vector.broadcast %3 : f32 to vector<1x128xf32>
    %27 = arith.mulf %11, %26 : vector<1x128xf32>
    %28 = arith.addf %25, %27 : vector<1x128xf32>
    %29 = vector.broadcast %5 : f32 to vector<1x128xf32>
    %30 = arith.addf %28, %29 : vector<1x128xf32>
    %31 = arith.negf %30 : vector<1x128xf32>
    %32 = math.exp %31 : vector<1x128xf32>
    %cst_2 = arith.constant 1.000000e+00 : f32
    %33 = vector.broadcast %cst_2 : f32 to vector<1x128xf32>
    %34 = arith.addf %33, %32 : vector<1x128xf32>
    %35 = arith.divf %33, %34 : vector<1x128xf32>
    %36 = vector.broadcast %6 : f32 to vector<1x128xf32>
    %37 = arith.mulf %23, %36 : vector<1x128xf32>
    %38 = vector.broadcast %7 : f32 to vector<1x128xf32>
    %39 = arith.mulf %35, %38 : vector<1x128xf32>
    %40 = arith.addf %37, %39 : vector<1x128xf32>
    %41 = vector.broadcast %8 : f32 to vector<1x128xf32>
    %42 = arith.addf %40, %41 : vector<1x128xf32>
    %43 = arith.negf %42 : vector<1x128xf32>
    %44 = math.exp %43 : vector<1x128xf32>
    %cst_3 = arith.constant 1.000000e+00 : f32
    %45 = vector.broadcast %cst_3 : f32 to vector<1x128xf32>
    %46 = arith.addf %45, %44 : vector<1x128xf32>
    %47 = arith.divf %45, %46 : vector<1x128xf32>
    %c0_4 = arith.constant 0 : index
    %c0_5 = arith.constant 0 : index
    %48 = vector.load %arg3[%c0_4, %c0_5] : memref<1x128xf32, #tpu.memory_space<vmem>>, vector<1x128xf32>
    tpu.vector_store %arg3[%c0_4, %c0_5], %47 {strides = array<i32>} : memref<1x128xf32, #tpu.memory_space<vmem>>, vector<1x128xf32>,
    return
  }
  func.func @transform_0(%arg0: i32) -> i32 {
    %c0_i32 = arith.constant 0 : i32
    %c0_i32_0 = arith.constant 0 : i32
    return %c0_i32 : i32
  }
  func.func @transform_1(%arg0: i32) -> (i32, i32) {
    %c0_i32 = arith.constant 0 : i32
    %c0_i32_0 = arith.constant 0 : i32
    return %c0_i32, %arg0 : i32, i32
  }
  func.func @transform_2(%arg0: i32) -> (i32, i32) {
    %c0_i32 = arith.constant 0 : i32
    %c0_i32_0 = arith.constant 0 : i32
    return %c0_i32, %arg0 : i32, i32
  }
}

</mosaic_0001>

<bundles_post_ra>
// kernel: mlp_forward.1
= control target key start
LH: loop header
LB: loop body
LE: loop exit
PB: predicated region body
PF: predicated region fallthrough
CT: control target
= control target key end

     0   :  { %7 = vsyncpa [#allocation3], 0  ;;  %s148_s0 = inlined_call_operand.vmem [shape: f32[9], index: 0, kind: input, shape index: {}]   ;;  %s149_s1 = inlined_call_operand.vmem [shape: f32[2,128], index: 1, kind: input, shape index: {}]   ;;  %s150_s2 = inlined_call_operand.vmem [shape: f32[1,128], index: 2, kind: output, shape index: {}]  }
   0x1   :  { %s14_s11 = sshll.u32 %s148_s0, 4  ;;  %s15_s11 = int_to_ptr.vmem [resolvable:$true] %s14_s11 }
   0x2   :  { %s109_s12 = scalar_lea.vmem %s15_s11, 16  ;;  %p114_p1 = scmp.lt.s32.totalorder %s15_s11, %s15_s11 }
   0x3   :  { %p110_p0 = scmp.ne.s32.totalorder %s15_s11, %s109_s12  ;;  %p115_p2 = scmp.lt.s32.totalorder %s109_s12, %s109_s12 }
   0x5   :  { %p116_p3 = por %p115_p2, %p114_p1 }
   0x7   :  { %p117_p4 = pnand %p116_p3, %p110_p0 }
   0x9   :  { %120 = shalt.err (!%p117_p4)
}
   0xa   :  { %s123_s13 = smov [#allocation2]  }
   0xb   :  { %17 = dma.vmem_to_smem %s15_s11, 16, %s123_s13, [#allocation3]  }
   0xc   :  { %121 = dma.done.wait [#allocation3], 16  }
   0xd   :  { %122 = vsyncadd [#allocation3], 4294967280 }
   0xe   :  { %23 = sfence }
   0xf   :  { %s24_s14 = sld [smem:[#allocation2]]  ;;  %s85_s15 = sld [smem:[#allocation2 + $0x1]]  ;;  %v33_v0 = vld [vmem:[%s149_s1] sm:$0x3] }
  0x10   :  { %s86_s16 = sld [smem:[#allocation2 + $0x2]]  ;;  %s87_s17 = sld [smem:[#allocation2 + $0x3]] }
  0x11   :  { %s88_s18 = sld [smem:[#allocation2 + $0x4]]  ;;  %s89_s19 = sld [smem:[#allocation2 + $0x5]] }
  0x12   :  { %s90_s1 = sld [smem:[#allocation2 + $0x6]]  ;;  %s91_s21 = sld [smem:[#allocation2 + $0x7]] }
  0x13   :  { %s92_s22 = sld [smem:[#allocation2 + $0x8]] }
  0x15   :  { %v34_v1 = vstv %s24_s14  ;;  %v36_v2 = vstv %s85_s15 }
  0x16   :  { %v35_v3 = vmul.f32 %v34_v1, %v33_v0  ;;  %v37_v4 = vmul.f32 %v36_v2, %v33_v0  ;;  %v50_v5 = vstv %s86_s16  ;;  %v52_v6 = vstv %s87_s17 }
  0x17   :  { %v51_v7 = vmul.f32 %v50_v5, %v33_v0  ;;  %v53_v8 = vmul.f32 %v52_v6, %v33_v0  ;;  %v42_v10 = vstv %s88_s18  ;;  %v58_v13 = vstv %s89_s19 }
  0x18   :  { %v39_v9 = vrot.slane %v37_v4, 1  ;;  %v66_v23 = vstv %s90_s1  ;;  %v68_v24 = vstv %s91_s21 }
  0x19   :  { %v55_v11 = vrot.slane %v53_v8, 1  ;;  %v71_v29 = vstv %s92_s22 }
  0x1a   :  { %v41_v12 = vadd.f32 %v39_v9, %v35_v3 }
  0x1b   :  { %v57_v14 = vadd.f32 %v55_v11, %v51_v7 }
  0x1c   :  { %v43_v15 = vadd.f32 %v42_v10, %v41_v12 }
  0x1d   :  { %v59_v16 = vadd.f32 %v58_v13, %v57_v14 }
  0x1e   :  { %v93_v17 = vmul.f32 -1.442695, %v43_v15 }
  0x1f   :  { %v94_v18 = vmul.f32 -1.442695, %v59_v16 }
  0x20   :  { %97 = vpow2.f32 %v93_v17 }
  0x21   :  { %99 = vpow2.f32 %v94_v18 }
  0x2a   :  { %v98_v19 = vpop.eup %97 }
  0x2b   :  { %v100_v20 = vpop.eup %99  ;;  %v47_v21 = vadd.f32 1.0, %v98_v19 }
  0x2c   :  { %v63_v22 = vadd.f32 1.0, %v100_v20 }
  0x2d   :  { %101 = vrcp.f32 %v47_v21 }
  0x2e   :  { %103 = vrcp.f32 %v63_v22 }
  0x37   :  { %v102_v25 = vpop.eup %101 }
  0x38   :  { %v104_v26 = vpop.eup %103  ;;  %v67_v27 = vmul.f32 %v102_v25, %v66_v23 }
  0x39   :  { %v69_v28 = vmul.f32 %v104_v26, %v68_v24 }
  0x3b   :  { %v70_v30 = vadd.f32 %v69_v28, %v67_v27 }
  0x3d   :  { %v72_v31 = vadd.f32 %v71_v29, %v70_v30 }
  0x3f   :  { %v95_v32 = vmul.f32 -1.442695, %v72_v31 }
  0x41   :  { %105 = vpow2.f32 %v95_v32 }
  0x4b   :  { %v106_v33 = vpop.eup %105 }
  0x4c   :  { %v76_v34 = vadd.f32 1.0, %v106_v33 }
  0x4e   :  { %107 = vrcp.f32 %v76_v34 }
  0x58   :  { %v108_v35 = vpop.eup %107 }
  0x59   :  { %79 = vst [vmem:[%s150_s2] sm:$0x1] %v108_v35 }
  0x5a   :  { %84 = vsyncpa [#allocation3], 1 }

</bundles_post_ra>
